<compile_context>
chip_gen: v6e
topology: v6e:2x2x1
jax: 0.10.0
libtpu: 0.0.40
codegen_flags: <defaults>
</compile_context>

<pallas_src>
import functools

import jax
import jax.numpy as jnp
from jax import lax
from jax.experimental import pallas as pl
from jax.experimental.pallas import tpu as pltpu

# ---- static model config (BaseCNN1D with its lazily-built layers bound to
#      the example input shape) ----
B = 2            # batch
C_IN = 4         # input channels (conv1 is built lazily from x.size(1))
L = 16           # sequence length
NUM_CLASSES = 10
K = 3            # conv kernel size
C1 = 8           # conv1 out channels
C2 = 16          # conv2 out channels
L1 = L - (K - 1)          # 14 after conv1
L2 = L1 - (K - 1)         # 12 after conv2
LP = L2 // 2              # 6  after MaxPool1d(2)
FLAT = C2 * LP            # 96 flattened size (fc1 built lazily from this)
HID = 128                 # fc1 out features

B_PAD = 8                 # pad batch rows to a full sublane tile
C1L1 = C1 * L1            # 112 conv1 output features
C1L1_PAD = 128            # ... padded to one full lane tile
FLAT_PAD = 128            # pooled/flatten features padded to one lane tile
NC_PAD = 128              # pad classes to a full lane tile (lane-dense store)
NEG_BIG = -1e30           # bias for padded class lanes -> exp() underflows to 0


def _cnn1d_kernel(x_ref, m1_ref, b1_ref, m2_ref, b2_ref,
                  wfc1_ref, bfc1_ref, wfc2_ref, bfc2_ref, out_ref):
    x = x_ref[...]                                                # (B_PAD, C_IN*L)

    # conv1 + ReLU : one matmul against the (lane-padded) conv band matrix
    h1 = jnp.maximum(
        jnp.dot(x, m1_ref[...], preferred_element_type=jnp.float32)
        + b1_ref[...], 0.0)                                       # (B_PAD, 128)

    # conv2 + ReLU for BOTH pool halves in a single matmul: columns
    # [0:128) are the even output positions, [128:256) the odd ones
    # (channel-major, already in the flatten order fc1 expects).
    y2 = jnp.maximum(
        jnp.dot(h1, m2_ref[...], preferred_element_type=jnp.float32)
        + b2_ref[...], 0.0)                                       # (B_PAD, 256)

    # MaxPool1d(kernel_size=2): elementwise max of the even/odd halves.
    # The split is at the 128-lane vreg boundary -> no relayout.
    p = jnp.maximum(y2[:, :FLAT_PAD], y2[:, FLAT_PAD:])           # (B_PAD, 128)

    # fc1 + ReLU : single dense matmul (padded rows of wfc1 are zero)
    z1 = jnp.maximum(
        jnp.dot(p, wfc1_ref[...], preferred_element_type=jnp.float32)
        + bfc1_ref[...], 0.0)                                     # (B_PAD, HID)

    # fc2 + softmax over (padded) class lanes; pad lanes get -1e30 bias
    logits = jnp.dot(z1, wfc2_ref[...],
                     preferred_element_type=jnp.float32) + bfc2_ref[...]
    mx = jnp.max(logits, axis=-1, keepdims=True)
    e = jnp.exp(logits - mx)
    out_ref[...] = e / jnp.sum(e, axis=-1, keepdims=True)         # (B_PAD, NC_PAD)


def _conv1d_as_matmul(w, l_in):
    """Dense band matrix M of shape (C_in*l_in, C_out*l_out) such that
    (x.reshape(B, C_in*l_in) @ M)[b, co*l_out + l] == Conv1d(x, w)[b, co, l]
    (VALID padding, stride 1)."""
    c_out, c_in, k = w.shape
    l_out = l_in - k + 1
    co = jnp.arange(c_out)[:, None, None, None]
    ci = jnp.arange(c_in)[None, :, None, None]
    kk = jnp.arange(k)[None, None, :, None]
    ll = jnp.arange(l_out)[None, None, None, :]
    shape = (c_out, c_in, k, l_out)
    rows = jnp.broadcast_to(ci * l_in + ll + kk, shape).reshape(-1)
    cols = jnp.broadcast_to(co * l_out + ll, shape).reshape(-1)
    vals = jnp.broadcast_to(w[:, :, :, None], shape).reshape(-1).astype(jnp.float32)
    return jnp.zeros((c_in * l_in, c_out * l_out), jnp.float32).at[rows, cols].set(vals)


@functools.partial(jax.jit)
def base_cnn1d_forward(x, params):
    (w1, b1, w2, b2, fc1_w, fc1_b, fc2_w, fc2_b) = params

    # ---- plain-JAX glue: restructure parameters once, outside the kernel ----
    # conv1 band matrix, output columns zero-padded 112 -> 128 lanes
    m1 = _conv1d_as_matmul(w1, L)                                 # (C_IN*L, 112)
    m1 = jnp.zeros((C_IN * L, C1L1_PAD), jnp.float32).at[:, :C1L1].set(m1)
    b1f = jnp.zeros((C1L1_PAD,), jnp.float32).at[:C1L1].set(jnp.repeat(b1, L1))
    b1f = jnp.broadcast_to(b1f[None, :], (B_PAD, C1L1_PAD))

    # conv2 band matrix; rows zero-padded 112 -> 128 to match padded h1.
    m2 = _conv1d_as_matmul(w2, L1)                                # (112, C2*L2)
    m2 = jnp.zeros((C1L1_PAD, C2 * L2), jnp.float32).at[:C1L1].set(m2)
    # Split columns into even / odd positions (column c*LP + j of the split
    # matrices is conv2 position 2j / 2j+1 of channel c == PyTorch's
    # channel-major flatten order after MaxPool1d(2)); pad each half 96 -> 128
    # lanes and concatenate -> single matmul for conv2 + both pool halves.
    cols_even = (jnp.arange(C2)[:, None] * L2
                 + 2 * jnp.arange(LP)[None, :]).reshape(-1)
    m2e = jnp.zeros((C1L1_PAD, FLAT_PAD), jnp.float32).at[:, :FLAT].set(
        m2[:, cols_even])
    m2o = jnp.zeros((C1L1_PAD, FLAT_PAD), jnp.float32).at[:, :FLAT].set(
        m2[:, cols_even + 1])
    m2cat = jnp.concatenate([m2e, m2o], axis=1)                   # (128, 256)
    b2h = jnp.zeros((FLAT_PAD,), jnp.float32).at[:FLAT].set(jnp.repeat(b2, LP))
    b2cat = jnp.broadcast_to(jnp.concatenate([b2h, b2h])[None, :],
                             (B_PAD, 2 * FLAT_PAD))

    # fc1: rows zero-padded 96 -> 128 (padded pooled lanes are zero anyway)
    wfc1 = jnp.zeros((FLAT_PAD, HID), jnp.float32).at[:FLAT].set(fc1_w.T)
    bfc1 = jnp.broadcast_to(fc1_b[None, :], (B_PAD, HID))

    # fc2: class lanes zero-padded 10 -> 128; pad lanes biased to -1e30
    wfc2 = jnp.zeros((HID, NC_PAD), jnp.float32).at[:, :NUM_CLASSES].set(fc2_w.T)
    bfc2 = jnp.broadcast_to(
        jnp.full((NC_PAD,), NEG_BIG, jnp.float32)
        .at[:NUM_CLASSES].set(fc2_b)[None, :], (B_PAD, NC_PAD))

    # pad batch rows to a full sublane tile; x flattened channel-major (ci*L+p)
    xf = jnp.zeros((B_PAD, C_IN * L), jnp.float32).at[:B].set(
        x.reshape(B, C_IN * L))

    vmem = lambda: pl.BlockSpec(memory_space=pltpu.MemorySpace.VMEM)
    out = pl.pallas_call(
        _cnn1d_kernel,
        out_shape=jax.ShapeDtypeStruct((B_PAD, NC_PAD), jnp.float32),
        in_specs=[vmem() for _ in range(9)],
        out_specs=vmem(),
    )(xf, m1, b1f, m2cat, b2cat, wfc1, bfc1, wfc2, bfc2)

    return out[:B, :NUM_CLASSES]


def reference_forward(x, params):
    """Independent plain-JAX reference of BaseCNN1D.forward."""
    (w1, b1, w2, b2, fc1_w, fc1_b, fc2_w, fc2_b) = params
    dn = ("NCH", "OIH", "NCH")
    y = lax.conv_general_dilated(x, w1, (1,), "VALID", dimension_numbers=dn)
    y = jax.nn.relu(y + b1[None, :, None])
    y = lax.conv_general_dilated(y, w2, (1,), "VALID", dimension_numbers=dn)
    y = jax.nn.relu(y + b2[None, :, None])
    bsz, c, l = y.shape
    y = y.reshape(bsz, c, l // 2, 2).max(axis=-1)                 # MaxPool1d(2)
    y = y.reshape(bsz, -1)                                        # flatten
    y = jax.nn.relu(y @ fc1_w.T + fc1_b)
    y = jax.nn.softmax(y @ fc2_w.T + fc2_b, axis=1)
    return y


def init_params(key):
    ks = jax.random.split(key, 8)
    w1 = 0.2 * jax.random.normal(ks[0], (C1, C_IN, K), jnp.float32)
    b1 = 0.1 * jax.random.normal(ks[1], (C1,), jnp.float32)
    w2 = 0.2 * jax.random.normal(ks[2], (C2, C1, K), jnp.float32)
    b2 = 0.1 * jax.random.normal(ks[3], (C2,), jnp.float32)
    fc1_w = 0.1 * jax.random.normal(ks[4], (HID, FLAT), jnp.float32)
    fc1_b = 0.1 * jax.random.normal(ks[5], (HID,), jnp.float32)
    fc2_w = 0.1 * jax.random.normal(ks[6], (NUM_CLASSES, HID), jnp.float32)
    fc2_b = 0.1 * jax.random.normal(ks[7], (NUM_CLASSES,), jnp.float32)
    return (w1, b1, w2, b2, fc1_w, fc1_b, fc2_w, fc2_b)


if __name__ == "__main__":
    key = jax.random.PRNGKey(0)
    k_x, k_p = jax.random.split(key)
    x = jax.random.normal(k_x, (B, C_IN, L), jnp.float32)
    params = init_params(k_p)

    out = base_cnn1d_forward(x, params)
    out = jax.block_until_ready(out)

    ref = jax.block_until_ready(reference_forward(x, params))
    assert out.shape == (B, NUM_CLASSES)
    assert jnp.allclose(out, ref, atol=1e-5, rtol=1e-5), (out, ref)
    # softmax rows sum to 1
    assert jnp.allclose(out.sum(axis=1), jnp.ones((B,)), atol=1e-5)

    print("KERNEL_OK")
</pallas_src>

<mosaic_0001>
module attributes {stable_mosaic.version = 11 : i64} {
  func.func @_cnn1d_kernel(%arg0: memref<8x64xf32, #tpu.memory_space<vmem>>, %arg1: memref<64x128xf32, #tpu.memory_space<vmem>>, %arg2: memref<8x128xf32, #tpu.memory_space<vmem>>, %arg3: memref<128x256xf32, #tpu.memory_space<vmem>>, %arg4: memref<8x256xf32, #tpu.memory_space<vmem>>, %arg5: memref<128x128xf32, #tpu.memory_space<vmem>>, %arg6: memref<8x128xf32, #tpu.memory_space<vmem>>, %arg7: memref<128x128xf32, #tpu.memory_space<vmem>>, %arg8: memref<8x128xf32, #tpu.memory_space<vmem>>, %arg9: memref<8x128xf32, #tpu.memory_space<vmem>>) attributes {dimension_semantics = [], scalar_prefetch = 0 : i64, scratch_operands = 0 : i64, tpu.core_type = #tpu.core_type<tc>} {
    %c0 = arith.constant 0 : index
    %c0_0 = arith.constant 0 : index
    %0 = vector.load %arg0[%c0, %c0_0] : memref<8x64xf32, #tpu.memory_space<vmem>>, vector<8x64xf32>
    %c0_1 = arith.constant 0 : index
    %c0_2 = arith.constant 0 : index
    %1 = vector.load %arg1[%c0_1, %c0_2] : memref<64x128xf32, #tpu.memory_space<vmem>>, vector<64x128xf32>
    %cst = arith.constant dense<0.000000e+00> : vector<8x128xf32>
    %2 = tpu.matmul %0, %1, %cst {dimension_numbers = #tpu.dot_dimension_numbers<[1], [0], [0], [1], [0, 0, 1, 1], [], []>} : vector<8x64xf32>, vector<64x128xf32>, vector<8x128xf32> -> vector<8x128xf32>
    %c0_3 = arith.constant 0 : index
    %c0_4 = arith.constant 0 : index
    %3 = vector.load %arg2[%c0_3, %c0_4] : memref<8x128xf32, #tpu.memory_space<vmem>>, vector<8x128xf32>
    %4 = arith.addf %2, %3 : vector<8x128xf32>
    %cst_5 = arith.constant 0.000000e+00 : f32
    %5 = vector.broadcast %cst_5 : f32 to vector<8x128xf32>
    %6 = arith.maximumf %4, %5 : vector<8x128xf32>
    %c0_6 = arith.constant 0 : index
    %c0_7 = arith.constant 0 : index
    %7 = vector.load %arg3[%c0_6, %c0_7] : memref<128x256xf32, #tpu.memory_space<vmem>>, vector<128x256xf32>
    %cst_8 = arith.constant dense<0.000000e+00> : vector<8x256xf32>
    %8 = tpu.matmul %6, %7, %cst_8 {dimension_numbers = #tpu.dot_dimension_numbers<[1], [0], [0], [1], [0, 0, 1, 1], [], []>} : vector<8x128xf32>, vector<128x256xf32>, vector<8x256xf32> -> vector<8x256xf32>
    %c0_9 = arith.constant 0 : index
    %c0_10 = arith.constant 0 : index
    %9 = vector.load %arg4[%c0_9, %c0_10] : memref<8x256xf32, #tpu.memory_space<vmem>>, vector<8x256xf32>
    %10 = arith.addf %8, %9 : vector<8x256xf32>
    %cst_11 = arith.constant 0.000000e+00 : f32
    %11 = vector.broadcast %cst_11 : f32 to vector<8x256xf32>
    %12 = arith.maximumf %10, %11 : vector<8x256xf32>
    %13 = vector.extract_strided_slice %12 {offsets = [0, 0], sizes = [8, 128], strides = [1, 1]} : vector<8x256xf32> to vector<8x128xf32>
    %14 = vector.extract_strided_slice %12 {offsets = [0, 128], sizes = [8, 128], strides = [1, 1]} : vector<8x256xf32> to vector<8x128xf32>
    %15 = arith.maximumf %13, %14 : vector<8x128xf32>
    %c0_12 = arith.constant 0 : index
    %c0_13 = arith.constant 0 : index
    %16 = vector.load %arg5[%c0_12, %c0_13] : memref<128x128xf32, #tpu.memory_space<vmem>>, vector<128x128xf32>
    %cst_14 = arith.constant dense<0.000000e+00> : vector<8x128xf32>
    %17 = tpu.matmul %15, %16, %cst_14 {dimension_numbers = #tpu.dot_dimension_numbers<[1], [0], [0], [1], [0, 0, 1, 1], [], []>} : vector<8x128xf32>, vector<128x128xf32>, vector<8x128xf32> -> vector<8x128xf32>
    %c0_15 = arith.constant 0 : index
    %c0_16 = arith.constant 0 : index
    %18 = vector.load %arg6[%c0_15, %c0_16] : memref<8x128xf32, #tpu.memory_space<vmem>>, vector<8x128xf32>
    %19 = arith.addf %17, %18 : vector<8x128xf32>
    %cst_17 = arith.constant 0.000000e+00 : f32
    %20 = vector.broadcast %cst_17 : f32 to vector<8x128xf32>
    %21 = arith.maximumf %19, %20 : vector<8x128xf32>
    %c0_18 = arith.constant 0 : index
    %c0_19 = arith.constant 0 : index
    %22 = vector.load %arg7[%c0_18, %c0_19] : memref<128x128xf32, #tpu.memory_space<vmem>>, vector<128x128xf32>
    %cst_20 = arith.constant dense<0.000000e+00> : vector<8x128xf32>
    %23 = tpu.matmul %21, %22, %cst_20 {dimension_numbers = #tpu.dot_dimension_numbers<[1], [0], [0], [1], [0, 0, 1, 1], [], []>} : vector<8x128xf32>, vector<128x128xf32>, vector<8x128xf32> -> vector<8x128xf32>
    %c0_21 = arith.constant 0 : index
    %c0_22 = arith.constant 0 : index
    %24 = vector.load %arg8[%c0_21, %c0_22] : memref<8x128xf32, #tpu.memory_space<vmem>>, vector<8x128xf32>
    %25 = arith.addf %23, %24 : vector<8x128xf32>
    %cst_23 = arith.constant dense<0xFF800000> : vector<8xf32>
    %26 = vector.multi_reduction <maximumf>, %25, %cst_23 [1] : vector<8x128xf32> to vector<8xf32>
    %27 = vector.shape_cast %26 : vector<8xf32> to vector<8x1xf32>
    %28 = vector.broadcast %27 : vector<8x1xf32> to vector<8x128xf32>
    %29 = arith.subf %25, %28 : vector<8x128xf32>
    %30 = math.exp %29 : vector<8x128xf32>
    %cst_24 = arith.constant dense<0.000000e+00> : vector<8xf32>
    %31 = vector.multi_reduction <add>, %30, %cst_24 [1] : vector<8x128xf32> to vector<8xf32>
    %32 = vector.shape_cast %31 : vector<8xf32> to vector<8x1xf32>
    %33 = vector.broadcast %32 : vector<8x1xf32> to vector<8x128xf32>
    %34 = arith.divf %30, %33 : vector<8x128xf32>
    %c0_25 = arith.constant 0 : index
    %c0_26 = arith.constant 0 : index
    %35 = vector.load %arg9[%c0_25, %c0_26] : memref<8x128xf32, #tpu.memory_space<vmem>>, vector<8x128xf32>
    tpu.vector_store %arg9[%c0_25, %c0_26], %34 {strides = array<i32>} : memref<8x128xf32, #tpu.memory_space<vmem>>, vector<8x128xf32>,
    return
  }
}

</mosaic_0001>

<bundles_post_ra>
// kernel: base_cnn1d_forward.1
= control target key start
LH: loop header
LB: loop body
LE: loop exit
PB: predicated region body
PF: predicated region fallthrough
CT: control target
= control target key end

     0   :  { %v553_v0 = vmov 0.0   ;;  %vm554_vm0 = vmmov 0   ;;  %vm42_vm1 = vcmask 523264   ;;  %s889_s1 = inlined_call_operand.vmem [shape: f32[64,128], index: 1, kind: input, shape index: {}]   ;;  %s890_s3 = inlined_call_operand.vmem [shape: f32[128,256], index: 3, kind: input, shape index: {}]   ;;  %s891_s0 = inlined_call_operand.vmem [shape: f32[8,64], index: 0, kind: input, shape index: {}]   ;;  %s892_s5 = inlined_call_operand.vmem [shape: f32[128,128], index: 5, kind: input, shape index: {}]   ;;  %s893_s2 = inlined_call_operand.vmem [shape: f32[8,128], index: 2, kind: input, shape index: {}]   ;;  %s894_s7 = inlined_call_operand.vmem [shape: f32[128,128], index: 7, kind: input, shape index: {}]   ;;  %s895_s4 = inlined_call_operand.vmem [shape: f32[8,256], index: 4, kind: input, shape index: {}]   ;;  %s896_s6 = inlined_call_operand.vmem [shape: f32[8,128], index: 6, kind: input, shape index: {}]   ;;  %s897_s8 = inlined_call_operand.vmem [shape: f32[8,128], index: 8, kind: input, shape index: {}]   ;;  %s898_s9 = inlined_call_operand.vmem [shape: f32[8,128], index: 9, kind: output, shape index: {}]  }
   0x1   :  { %458 = vmatprep.subr.mxu0 %v553_v0  ;;  %v40_v1 = vld [vmem:[%s889_s1 + $0x38] sm:$0xff]  ;;  %v39_v2 = vld [vmem:[%s889_s1 + $0x30] sm:$0xff]  ;;  %474 = vmatprep.mubr.msk.f32.mxu0 %vm554_vm0, %v553_v0  ;;  %v38_v3 = vld [vmem:[%s889_s1 + $0x28] sm:$0xff] }
   0x2   :  { %459 = vmatpush3.msra.mxu0 %v40_v1  ;;  %215 = vmatprep.mubr.f32.mxu1 %v553_v0  ;;  %v148_v4 = vld [vmem:[%s890_s3 + $0xf8] sm:$0xff]  ;;  %v147_v5 = vld [vmem:[%s890_s3 + $0xf0] sm:$0xff]  ;;  %v146_v6 = vld [vmem:[%s890_s3 + $0xe8] sm:$0xff] }
   0x3   :  { %460 = vmatprep.subr.mxu0 %v553_v0  ;;  %v37_v7 = vld [vmem:[%s889_s1 + $0x20] sm:$0xff]  ;;  %151 = vmatprep.subr.mxu1 %v148_v4  ;;  %v144_v9 = vld [vmem:[%s890_s3 + $0xd8] sm:$0xff]  ;;  %v143_v11 = vld [vmem:[%s890_s3 + $0xd0] sm:$0xff] }
   0x4   :  { %461 = vmatpush3.msra.mxu0 %v39_v2  ;;  %v145_v8 = vld [vmem:[%s890_s3 + $0xe0] sm:$0xff]  ;;  %152 = vmatpush1.msra.mxu1 %v147_v5  ;;  %v36_v10 = vld [vmem:[%s889_s1 + $0x18] sm:$0xff]  ;;  %v142_v12 = vld [vmem:[%s890_s3 + $0xc8] sm:$0xff] }
   0x5   :  { %462 = vmatprep.subr.mxu0 %v553_v0  ;;  %153 = vmatprep.subr.mxu1 %v146_v6  ;;  %v35_v13 = vld [vmem:[%s889_s1 + $0x10] sm:$0xff]  ;;  %v141_v14 = vld [vmem:[%s890_s3 + $0xc0] sm:$0xff]  ;;  %v140_v15 = vld [vmem:[%s890_s3 + $0xb8] sm:$0xff] }
   0x6   :  { %463 = vmatpush3.msra.mxu0 %v38_v3  ;;  %154 = vmatpush1.msra.mxu1 %v145_v8  ;;  %v34_v16 = vld [vmem:[%s889_s1 + $0x8] sm:$0xff]  ;;  %v139_v17 = vld [vmem:[%s890_s3 + $0xb0] sm:$0xff]  ;;  %v33_v19 = vld [vmem:[%s889_s1] sm:$0xff] }
   0x7   :  { %464 = vmatprep.subr.mxu0 %v553_v0  ;;  %155 = vmatprep.subr.mxu1 %v144_v9  ;;  %v138_v18 = vld [vmem:[%s890_s3 + $0xa8] sm:$0xff]  ;;  %v137_v20 = vld [vmem:[%s890_s3 + $0xa0] sm:$0xff]  ;;  %v136_v22 = vld [vmem:[%s890_s3 + $0x98] sm:$0xff] }
   0x8   :  { %465 = vmatpush3.msra.mxu0 %v37_v7  ;;  %156 = vmatpush1.msra.mxu1 %v143_v11  ;;  %v32_v21 = vld [vmem:[%s891_s0] sm:$0xff]  ;;  %v135_v23 = vld [vmem:[%s890_s3 + $0x90] sm:$0xff]  ;;  %v134_v24 = vld [vmem:[%s890_s3 + $0x88] sm:$0xff] }
   0x9   :  { %466 = vmatprep.subr.mxu0 %v553_v0  ;;  %157 = vmatprep.subr.mxu1 %v142_v12  ;;  %v133_v25 = vld [vmem:[%s890_s3 + $0x80] sm:$0xff]  ;;  %v132_v26 = vld [vmem:[%s890_s3 + $0x78] sm:$0xff]  ;;  %v131_v27 = vld [vmem:[%s890_s3 + $0x70] sm:$0xff] }
   0xa   :  { %467 = vmatpush3.msra.mxu0 %v36_v10  ;;  %158 = vmatpush1.msra.mxu1 %v141_v14  ;;  %v130_v28 = vld [vmem:[%s890_s3 + $0x68] sm:$0xff]  ;;  %v129_v29 = vld [vmem:[%s890_s3 + $0x60] sm:$0xff]  ;;  %v128_v30 = vld [vmem:[%s890_s3 + $0x58] sm:$0xff] }
   0xb   :  { %468 = vmatprep.subr.mxu0 %v553_v0  ;;  %159 = vmatprep.subr.mxu1 %v140_v15  ;;  %v127_v31 = vld [vmem:[%s890_s3 + $0x50] sm:$0xff]  ;;  %v126_v32 = vld [vmem:[%s890_s3 + $0x48] sm:$0xff]  ;;  %v125_v33 = vld [vmem:[%s890_s3 + $0x40] sm:$0xff] }
   0xc   :  { %469 = vmatpush3.msra.mxu0 %v35_v13  ;;  %160 = vmatpush1.msra.mxu1 %v139_v17  ;;  %v124_v34 = vld [vmem:[%s890_s3 + $0x38] sm:$0xff]  ;;  %v123_v35 = vld [vmem:[%s890_s3 + $0x30] sm:$0xff]  ;;  %v122_v36 = vld [vmem:[%s890_s3 + $0x28] sm:$0xff] }
   0xd   :  { %470 = vmatprep.subr.mxu0 %v553_v0  ;;  %161 = vmatprep.subr.mxu1 %v138_v18  ;;  %v121_v37 = vld [vmem:[%s890_s3 + $0x20] sm:$0xff]  ;;  %v120_v38 = vld [vmem:[%s890_s3 + $0x18] sm:$0xff]  ;;  %v119_v39 = vld [vmem:[%s890_s3 + $0x10] sm:$0xff] }
   0xe   :  { %471 = vmatpush3.msra.mxu0 %v34_v16  ;;  %162 = vmatpush1.msra.mxu1 %v137_v20  ;;  %v118_v40 = vld [vmem:[%s890_s3 + $0x8] sm:$0xff]  ;;  %v117_v41 = vld [vmem:[%s890_s3] sm:$0xff]  ;;  %v240_v42 = vld [vmem:[%s892_s5 + $0x78] sm:$0xff] }
   0xf   :  { %472 = vmatprep.subr.mxu0 %v553_v0  ;;  %163 = vmatprep.subr.mxu1 %v136_v22  ;;  %v239_v43 = vld [vmem:[%s892_s5 + $0x70] sm:$0xff]  ;;  %v238_v44 = vld [vmem:[%s892_s5 + $0x68] sm:$0xff]  ;;  %v237_v45 = vld [vmem:[%s892_s5 + $0x60] sm:$0xff] }
  0x10   :  { %473 = vmatpush3.msra.mxu0 %v33_v19  ;;  %164 = vmatpush1.msra.mxu1 %v135_v23  ;;  %v236_v46 = vld [vmem:[%s892_s5 + $0x58] sm:$0xff]  ;;  %v235_v47 = vld [vmem:[%s892_s5 + $0x50] sm:$0xff]  ;;  %v234_v48 = vld [vmem:[%s892_s5 + $0x48] sm:$0xff] }
  0x11   :  { %475 = vmatmul.mubr.msk.f32.vlgmr.msra.gmra.mxu0 %vm42_vm1, %v32_v21  ;;  %477 = vmatprep.subr.mxu0 %v553_v0  ;;  %v233_v49 = vld [vmem:[%s892_s5 + $0x40] sm:$0xff]  ;;  %v232_v50 = vld [vmem:[%s892_s5 + $0x38] sm:$0xff]  ;;  %v231_v51 = vld [vmem:[%s892_s5 + $0x30] sm:$0xff] }
  0x12   :  { %165 = vmatprep.subr.mxu1 %v134_v24  ;;  %509 = vmatprep.mubr.msk.f32.mxu0 %vm554_vm0, %v553_v0  ;;  %v230_v52 = vld [vmem:[%s892_s5 + $0x28] sm:$0xff]  ;;  %v41_v53 = vld [vmem:[%s893_s2] sm:$0xff]  ;;  %v228_v59 = vld [vmem:[%s892_s5 + $0x18] sm:$0xff] }
  0x13   :  { %166 = vmatpush1.msra.mxu1 %v133_v25  ;;  %478 = vmatpush3.msra.mxu0 %v240_v42  ;;  %v229_v58 = vld [vmem:[%s892_s5 + $0x20] sm:$0xff]  ;;  %v227_v60 = vld [vmem:[%s892_s5 + $0x10] sm:$0xff]  ;;  %v226_v61 = vld [vmem:[%s892_s5 + $0x8] sm:$0xff] }
  0x14   :  { %167 = vmatprep.subr.mxu1 %v132_v26  ;;  %479 = vmatprep.subr.mxu0 %v553_v0  ;;  %v225_v62 = vld [vmem:[%s892_s5] sm:$0xff]  ;;  %v328_v63 = vld [vmem:[%s894_s7 + $0x78] sm:$0xff]  ;;  %v327_v1 = vld [vmem:[%s894_s7 + $0x70] sm:$0xff] }
  0x15   :  { %168 = vmatpush1.msra.mxu1 %v131_v27  ;;  %480 = vmatpush3.msra.mxu0 %v239_v43  ;;  %v326_v2 = vld [vmem:[%s894_s7 + $0x68] sm:$0xff]  ;;  %v325_v3 = vld [vmem:[%s894_s7 + $0x60] sm:$0xff]  ;;  %v324_v4 = vld [vmem:[%s894_s7 + $0x58] sm:$0xff] }
  0x16   :  { %169 = vmatprep.subr.mxu1 %v130_v28  ;;  %481 = vmatprep.subr.mxu0 %v553_v0  ;;  %v323_v5 = vld [vmem:[%s894_s7 + $0x50] sm:$0xff]  ;;  %v322_v6 = vld [vmem:[%s894_s7 + $0x48] sm:$0xff]  ;;  %v321_v7 = vld [vmem:[%s894_s7 + $0x40] sm:$0xff] }
  0x17   :  { %170 = vmatpush1.msra.mxu1 %v129_v29  ;;  %482 = vmatpush3.msra.mxu0 %v238_v44  ;;  %v320_v8 = vld [vmem:[%s894_s7 + $0x38] sm:$0xff]  ;;  %v319_v9 = vld [vmem:[%s894_s7 + $0x30] sm:$0xff]  ;;  %v318_v10 = vld [vmem:[%s894_s7 + $0x28] sm:$0xff] }
  0x18   :  { %171 = vmatprep.subr.mxu1 %v128_v30  ;;  %483 = vmatprep.subr.mxu0 %v553_v0  ;;  %v317_v11 = vld [vmem:[%s894_s7 + $0x20] sm:$0xff]  ;;  %v316_v12 = vld [vmem:[%s894_s7 + $0x18] sm:$0xff]  ;;  %v150_v15 = vld [vmem:[%s895_s4 + $0x8] sm:$0xff] }
  0x19   :  { %172 = vmatpush1.msra.mxu1 %v127_v31  ;;  %484 = vmatpush3.msra.mxu0 %v237_v45  ;;  %v149_v13 = vld [vmem:[%s895_s4] sm:$0xff]  ;;  %v315_v22 = vld [vmem:[%s894_s7 + $0x10] sm:$0xff]  ;;  %v314_v23 = vld [vmem:[%s894_s7 + $0x8] sm:$0xff] }
  0x1a   :  { %173 = vmatprep.subr.mxu1 %v126_v32  ;;  %485 = vmatprep.subr.mxu0 %v553_v0  ;;  %v313_v24 = vld [vmem:[%s894_s7] sm:$0xff] }
  0x1b   :  { %174 = vmatpush1.msra.mxu1 %v125_v33  ;;  %486 = vmatpush3.msra.mxu0 %v236_v46  ;;  %v241_v25 = vld [vmem:[%s896_s6] sm:$0xff] }
  0x1c   :  { %175 = vmatprep.subr.mxu1 %v124_v34  ;;  %487 = vmatprep.subr.mxu0 %v553_v0  ;;  %v329_v30 = vld [vmem:[%s897_s8] sm:$0xff] }
  0x1d   :  { %176 = vmatpush1.msra.mxu1 %v123_v35  ;;  %488 = vmatpush3.msra.mxu0 %v235_v47 }
  0x1e   :  { %177 = vmatprep.subr.mxu1 %v122_v36  ;;  %489 = vmatprep.subr.mxu0 %v553_v0 }
  0x1f   :  { %178 = vmatpush1.msra.mxu1 %v121_v37  ;;  %490 = vmatpush3.msra.mxu0 %v234_v48 }
  0x20   :  { %179 = vmatprep.subr.mxu1 %v120_v38  ;;  %491 = vmatprep.subr.mxu0 %v553_v0 }
  0x21   :  { %180 = vmatpush1.msra.mxu1 %v119_v39  ;;  %492 = vmatpush3.msra.mxu0 %v233_v49 }
  0x22   :  { %181 = vmatprep.subr.mxu1 %v118_v40  ;;  %493 = vmatprep.subr.mxu0 %v553_v0 }
  0x23   :  { %182 = vmatpush1.msra.mxu1 %v117_v41  ;;  %494 = vmatpush3.msra.mxu0 %v232_v50 }
  0x24   :  { %512 = vmatprep.subr.mxu1 %v553_v0  ;;  %495 = vmatprep.subr.mxu0 %v553_v0 }
  0x25   :  { %496 = vmatpush3.msra.mxu0 %v231_v51 }
  0x26   :  { %497 = vmatprep.subr.mxu0 %v553_v0 }
  0x27   :  { %498 = vmatpush3.msra.mxu0 %v230_v52 }
  0x28   :  { %499 = vmatprep.subr.mxu0 %v553_v0 }
  0x29   :  { %500 = vmatpush3.msra.mxu0 %v229_v58 }
  0x2a   :  { %501 = vmatprep.subr.mxu0 %v553_v0 }
  0x2b   :  { %502 = vmatpush3.msra.mxu0 %v228_v59 }
  0x2c   :  { %503 = vmatprep.subr.mxu0 %v553_v0 }
  0x2d   :  { %504 = vmatpush3.msra.mxu0 %v227_v60 }
  0x2e   :  { %505 = vmatprep.subr.mxu0 %v553_v0 }
  0x2f   :  { %506 = vmatpush3.msra.mxu0 %v226_v61 }
  0x30   :  { %507 = vmatprep.subr.mxu0 %v553_v0 }
  0x31   :  { %508 = vmatpush3.msra.mxu0 %v225_v62 }
  0xd1   :  { %v112_v54 = vpop.f32.mrf.mxu0 }
  0xd2   :  { %v113_v55 = vadd.f32 %v112_v54, %v41_v53 }
  0xd3   :  { %v476_v56 = vpop.f32.mrf.mxu0 }
  0xd4   :  { %v116_v57 = vmax.f32 %v113_v55, 0.0 }
  0xd6   :  { %216 = vmatmul.mubr.f32.vlgmr.msra.gmra.mxu1 %v116_v57 }
  0xd7   :  { %544 = vmatprep.mubr.msk.f32.mxu1 %vm554_vm0, %v553_v0  ;;  %513 = vmatpush3.msra.mxu1 %v328_v63 }
  0xd8   :  { %514 = vmatprep.subr.mxu1 %v553_v0 }
  0xd9   :  { %515 = vmatpush3.msra.mxu1 %v327_v1 }
  0xda   :  { %516 = vmatprep.subr.mxu1 %v553_v0 }
  0xdb   :  { %517 = vmatpush3.msra.mxu1 %v326_v2 }
  0xdc   :  { %518 = vmatprep.subr.mxu1 %v553_v0 }
  0xdd   :  { %519 = vmatpush3.msra.mxu1 %v325_v3 }
  0xde   :  { %520 = vmatprep.subr.mxu1 %v553_v0 }
  0xdf   :  { %521 = vmatpush3.msra.mxu1 %v324_v4 }
  0xe0   :  { %522 = vmatprep.subr.mxu1 %v553_v0 }
  0xe1   :  { %523 = vmatpush3.msra.mxu1 %v323_v5 }
  0xe2   :  { %524 = vmatprep.subr.mxu1 %v553_v0 }
  0xe3   :  { %525 = vmatpush3.msra.mxu1 %v322_v6 }
  0xe4   :  { %526 = vmatprep.subr.mxu1 %v553_v0 }
  0xe5   :  { %527 = vmatpush3.msra.mxu1 %v321_v7 }
  0xe6   :  { %528 = vmatprep.subr.mxu1 %v553_v0 }
  0xe7   :  { %529 = vmatpush3.msra.mxu1 %v320_v8 }
  0xe8   :  { %530 = vmatprep.subr.mxu1 %v553_v0 }
  0xe9   :  { %531 = vmatpush3.msra.mxu1 %v319_v9 }
  0xea   :  { %532 = vmatprep.subr.mxu1 %v553_v0 }
  0xeb   :  { %533 = vmatpush3.msra.mxu1 %v318_v10 }
  0xec   :  { %534 = vmatprep.subr.mxu1 %v553_v0 }
  0xed   :  { %535 = vmatpush3.msra.mxu1 %v317_v11 }
  0xee   :  { %536 = vmatprep.subr.mxu1 %v553_v0 }
  0xef   :  { %537 = vmatpush3.msra.mxu1 %v316_v12 }
  0xf0   :  { %538 = vmatprep.subr.mxu1 %v553_v0 }
  0xf1   :  { %539 = vmatpush3.msra.mxu1 %v315_v22 }
  0xf2   :  { %540 = vmatprep.subr.mxu1 %v553_v0 }
  0xf3   :  { %541 = vmatpush3.msra.mxu1 %v314_v23 }
  0xf4   :  { %542 = vmatprep.subr.mxu1 %v553_v0 }
  0xf5   :  { %543 = vmatpush3.msra.mxu1 %v313_v24 }
 0x196   :  { %v217_v14 = vpop.f32.mrf.mxu1 }
 0x197   :  { %v218_v16 = vadd.f32 %v217_v14, %v149_v13 }
 0x198   :  { %v219_v17 = vpop.f32.mrf.mxu1 }
 0x199   :  { %v220_v18 = vadd.f32 %v219_v17, %v150_v15  ;;  %v222_v19 = vmax.f32 %v218_v16, 0.0 }
 0x19b   :  { %v223_v20 = vmax.f32 %v220_v18, 0.0 }
 0x19d   :  { %v224_v21 = vmax.f32 %v222_v19, %v223_v20 }
 0x19f   :  { %510 = vmatmul.mubr.f32.vlgmr.msra.gmra.mxu0 %v224_v21 }
 0x25f   :  { %v308_v26 = vpop.f32.mrf.mxu0 }
 0x260   :  { %v309_v27 = vadd.f32 %v308_v26, %v241_v25 }
 0x261   :  { %v511_v28 = vpop.f32.mrf.mxu0 }
 0x262   :  { %v312_v29 = vmax.f32 %v309_v27, 0.0 }
 0x264   :  { %545 = vmatmul.mubr.f32.vlgmr.msra.gmra.mxu1 %v312_v29 }
 0x324   :  { %v396_v31 = vpop.f32.mrf.mxu1 }
 0x325   :  { %v397_v0 = vadd.f32 %v396_v31, %v329_v30 }
 0x326   :  { %v546_v32 = vpop.f32.mrf.mxu1 }
 0x327   :  { %400 = vmax.xlane.f32.xlu0 %v397_v0 }
 0x3b0   :  { %v401_v33 = vpop.xlane.xlu0 %400 }
 0x3b1   :  { %v402_v34 = vsub.f32 %v397_v0, %v401_v33 }
 0x3b3   :  { %v403_v35 = vmul.f32 1.442695, %v402_v34 }
 0x3b5   :  { %549 = vpow2.f32 %v403_v35 }
 0x3c2   :  { %v550_v36 = vpop.eup %549 }
 0x3c3   :  { %405 = vadd.xlane.f32.xlu0 %v550_v36 }
 0x44c   :  { %v406_v37 = vpop.xlane.xlu0 %405 }
 0x44d   :  { %551 = vrcp.f32 %v406_v37 }
 0x45a   :  { %v552_v38 = vpop.eup %551 }
 0x45b   :  { %v408_v39 = vmul.f32 %v552_v38, %v550_v36 }
 0x45d   :  { %409 = vst [vmem:[%s898_s9] sm:$0xff] %v408_v39 }

</bundles_post_ra>
